<compile_context>
chip_gen: v7x
topology: tpu7x:2x2x1
jax: 0.10.0
libtpu: 0.0.40
codegen_flags: <defaults>
</compile_context>

<pallas_src>
import math

import numpy as np
import jax
import jax.numpy as jnp
from jax import lax
from jax.experimental import pallas as pl
from jax.experimental.pallas import tpu as pltpu


# ----------------------------------------------------------------------------
# Pallas kernel 1: linear layer (matmul + bias), tiled over rows (M)
# ----------------------------------------------------------------------------
def _linear_kernel(x_ref, w_ref, b_ref, o_ref):
    # bf16 MXU operands (native 256x256 path on v6e/v7x), fp32 accumulation + fp32 bias.
    o_ref[...] = (jnp.dot(x_ref[...].astype(jnp.bfloat16),
                          w_ref[...].astype(jnp.bfloat16),
                          preferred_element_type=jnp.float32)
                  + b_ref[...]).astype(o_ref.dtype)


def pallas_linear(x, w, b, *, tile_m=512):
    """y = x @ w + b.  Row-tiled (these matmuls are HBM-bound, so large M tiles), the
    (K, Nout) weight block stays resident (constant index map).  Nout is zero-padded to a
    multiple of 128 so the output block is lane-dense (no masked vst.msk partial stores);
    the pad is sliced off outside the kernel."""
    orig_shape = x.shape
    K = orig_shape[-1]
    M = int(np.prod(orig_shape[:-1]))
    Nout = w.shape[1]
    Nout_p = ((Nout + 127) // 128) * 128
    if Nout_p != Nout:
        w = jnp.pad(w, ((0, 0), (0, Nout_p - Nout)))
        b = jnp.pad(b, ((0, Nout_p - Nout),))
    x2 = x.reshape(M, K)
    tm = tile_m if M >= tile_m else M         # tm == M -> full-dim block (always legal)
    # NOTE: if M % tm != 0 the padded rows of the last block feed the matmul and rely on
    # masked writeback to be dropped; every M used here divides evenly.
    out = pl.pallas_call(
        _linear_kernel,
        out_shape=jax.ShapeDtypeStruct((M, Nout_p), x.dtype),
        grid=(pl.cdiv(M, tm),),
        in_specs=[
            pl.BlockSpec((tm, K), lambda i: (i, 0)),
            pl.BlockSpec((K, Nout_p), lambda i: (0, 0)),   # weight resident across M tiles
            pl.BlockSpec((1, Nout_p), lambda i: (0, 0)),
        ],
        out_specs=pl.BlockSpec((tm, Nout_p), lambda i: (i, 0)),
        compiler_params=pltpu.CompilerParams(dimension_semantics=("parallel",)),
    )(x2, w, b.reshape(1, Nout_p))
    if Nout_p != Nout:
        out = out[:, :Nout]
    return out.reshape(orig_shape[:-1] + (Nout,))


# ----------------------------------------------------------------------------
# Pallas kernel 2: multi-scale deformable attention core
# (bilinear sampling, zero padding, align_corners=False, + weighted sum)
# ----------------------------------------------------------------------------
def _make_msda_kernel(level_specs, n_points, n_lvls):
    # level_specs: static list of (H, W, start_index) for each of n_images*n_levels levels.
    P = n_points
    NLP = n_lvls * P

    def kernel(value_ref, geom_ref, out_ref):
        head_dim = value_ref.shape[2]
        tq = out_ref.shape[3]

        acc = jnp.zeros((head_dim, tq), jnp.float32)

        # iotas are tiny (H or W rows) and shared across levels with equal extent
        # (JAX does not CSE broadcast_in_dim, so cache explicitly).
        iota_cache = {}

        def get_iota(n):
            if n not in iota_cache:
                iota_cache[n] = lax.broadcasted_iota(jnp.int32, (n, tq), 0)
            return iota_cache[n]

        for li, (H, W, start) in enumerate(level_specs):
            HW = H * W
            # lane-dense (P, tq) reads: queries on the 128-lane axis
            lx = geom_ref[0, 0, li * P:(li + 1) * P, :].astype(jnp.float32)
            ly = geom_ref[0, 0, NLP + li * P:NLP + (li + 1) * P, :].astype(jnp.float32)
            aw = geom_ref[0, 0, 2 * NLP + li * P:2 * NLP + (li + 1) * P, :].astype(jnp.float32)

            # grid_sample(align_corners=False) pixel coordinates
            ix = lx * W - 0.5
            iy = ly * H - 0.5
            x0 = jnp.floor(ix)
            y0 = jnp.floor(iy)
            fx = ix - x0
            fy = iy - y0
            x0i = x0.astype(jnp.int32)
            y0i = y0.astype(jnp.int32)

            w_iota = get_iota(W)
            h_iota = get_iota(H)

            # Separable one-hot build: all 4 bilinear corners come out of ONE broadcast
            # multiply-add of a row mix (H, tq) with a column mix (W, tq).  Out-of-range
            # corners never match the iota (indices in [0, W)/[0, H)) -> zero padding.
            a_lvl = jnp.zeros((H, W, tq), jnp.float32)
            for p in range(P):
                x0p = x0i[p:p + 1]
                y0p = y0i[p:p + 1]
                fxp = fx[p:p + 1]
                fyp = fy[p:p + 1]
                awp = aw[p:p + 1]
                xmix = (jnp.where(w_iota == x0p, 1.0 - fxp, 0.0)
                        + jnp.where(w_iota == x0p + 1, fxp, 0.0))
                ymix = (jnp.where(h_iota == y0p, 1.0 - fyp, 0.0)
                        + jnp.where(h_iota == y0p + 1, fyp, 0.0)) * awp
                a_lvl = a_lvl + ymix[:, None, :] * xmix[None, :, :]

            # Per-level MXU accumulation (no (Len_in, Len_q) scratch):
            # (head_dim, HW) @ (HW, tq) with bf16 operands, fp32 accumulation.
            v_lvl = value_ref[0, 0, :, start:start + HW].astype(jnp.bfloat16)
            acc = acc + jnp.dot(v_lvl,
                                a_lvl.reshape(HW, tq).astype(jnp.bfloat16),
                                preferred_element_type=jnp.float32)

        out_ref[0, 0] = acc.astype(out_ref.dtype)

    return kernel


def msda_pallas(value_t, locx, locy, attw, level_specs, *, tile_q=512):
    """value_t: (N, n_heads, Len_in, head_dim); loc*/attw: (N, n_heads, NL, Len_q, P)."""
    N, n_heads, Len_in, head_dim = value_t.shape
    _, _, NL, Len_q, P = locx.shape
    assert sum(h * w for h, w, _ in level_specs) == Len_in
    for (_, W, _) in level_specs:
        # keeps the (H, W, TQ) -> (H*W, TQ) collapse a layout no-op (sublane-exact)
        assert W % 8 == 0, "level width must be a multiple of 8 for the separable build"

    # Len_q grid axis keeps the per-step fp32 (HW, TQ) working set well inside VMEM
    # (v7x: 64 MiB) and gives the TensorCores more parallel work than N*n_heads alone.
    tq = tile_q if Len_q % tile_q == 0 else Len_q

    # Lane-dense layouts: Len_q goes on the lane axis, the tiny (NL, P) axes fold onto
    # sublanes; value is pre-transposed so the per-level matmul is fully canonical.
    value_dk = value_t.transpose(0, 1, 3, 2)                 # (N, H, head_dim, Len_in)

    def lane_dense(x):                                       # (N,H,NL,Lq,P) -> (N,H,NL*P,Lq)
        return x.transpose(0, 1, 2, 4, 3).reshape(N, n_heads, NL * P, Len_q)

    # Pack loc_x / loc_y / attention weights on sublanes => one DMA per grid step.
    geom = jnp.concatenate(
        [lane_dense(locx), lane_dense(locy), lane_dense(attw)], axis=2)

    kernel = _make_msda_kernel(level_specs, P, NL)
    out_t = pl.pallas_call(
        kernel,
        out_shape=jax.ShapeDtypeStruct((N, n_heads, head_dim, Len_q), value_t.dtype),
        grid=(N, n_heads, Len_q // tq),
        in_specs=[
            pl.BlockSpec((1, 1, head_dim, Len_in), lambda b, h, qi: (b, h, 0, 0)),
            pl.BlockSpec((1, 1, 3 * NL * P, tq), lambda b, h, qi: (b, h, 0, qi)),
        ],
        out_specs=pl.BlockSpec((1, 1, head_dim, tq), lambda b, h, qi: (b, h, 0, qi)),
        compiler_params=pltpu.CompilerParams(
            dimension_semantics=("parallel", "parallel", "parallel")),
    )(value_dk, geom)
    return out_t.transpose(0, 1, 3, 2)                       # (N, n_heads, Len_q, head_dim)


# Pure-JAX reference for the deformable-attention core (same math, gather-based, fp32).
def msda_reference(value_t, locx, locy, attw, level_specs):
    N, NH, Len_in, d = value_t.shape
    _, _, NL, Lq, P = locx.shape
    out = jnp.zeros((N, NH, Lq, d), jnp.float32)
    for li, (H, W, start) in enumerate(level_specs):
        HW = H * W
        v = value_t[:, :, start:start + HW, :].astype(jnp.float32)
        ix = locx[:, :, li].astype(jnp.float32) * W - 0.5
        iy = locy[:, :, li].astype(jnp.float32) * H - 0.5
        x0 = jnp.floor(ix)
        y0 = jnp.floor(iy)
        fx = ix - x0
        fy = iy - y0
        aw = attw[:, :, li].astype(jnp.float32)
        for dx, dy in ((0, 0), (1, 0), (0, 1), (1, 1)):
            cx = x0 + dx
            cy = y0 + dy
            wx = fx if dx == 1 else (1.0 - fx)
            wy = fy if dy == 1 else (1.0 - fy)
            valid = (cx >= 0) & (cx < W) & (cy >= 0) & (cy < H)
            idx = jnp.clip(cy.astype(jnp.int32) * W + cx.astype(jnp.int32), 0, HW - 1)
            g = jnp.take_along_axis(v, idx.reshape(N, NH, Lq * P, 1), axis=2)
            g = g.reshape(N, NH, Lq, P, d)
            w = (wx * wy * valid.astype(jnp.float32) * aw)[..., None]
            out = out + (g * w).sum(axis=3)
    return out


# ----------------------------------------------------------------------------
# MMFS forward pass
# ----------------------------------------------------------------------------
def mmfs_forward(params, cfg, query, reference_points, input_flatten,
                 input_spatial_shapes, input_level_start_index,
                 attention_mask, input_padding_mask=None, use_pallas=True):
    d_model = cfg["d_model"]
    n_levels = cfg["n_levels"]
    n_heads = cfg["n_heads"]
    n_points = cfg["n_points"]
    ratio = cfg["ratio"]
    level_specs = cfg["level_specs"]

    linear = pallas_linear if use_pallas else (lambda x, w, b: x @ w + b)

    N, Len_q, _ = query.shape
    _, n_images, hw, _ = input_flatten.shape
    Len_in = n_images * hw
    nlevels = n_images * n_levels
    d_v = int(d_model * ratio)
    head_dim = d_v // n_heads

    # ---- image relative positions (2-D attention_mask branch) ----
    amask_i = attention_mask.astype(jnp.int32)                       # (N, n_images)
    image_num_tot = amask_i.sum(-1, keepdims=True)
    image_num_prev = jnp.cumsum(amask_i, axis=-1)
    image_relpos = (image_num_tot + 1 - image_num_prev) * amask_i
    image_relpos = jnp.repeat(image_relpos[:, :, None], Len_q, axis=2)  # (N, n_images, Len_q)
    # TODO(synk): 3-D (per-query) attention_mask branch of the PyTorch forward not implemented.

    # ---- value projection ----
    value = linear(input_flatten, params["value_proj_w"], params["value_proj_b"])
    if input_padding_mask is not None:
        value = jnp.where(input_padding_mask[..., None], 0.0, value)
    value = value.reshape(N, Len_in, n_heads, head_dim)

    # ---- query prep: replicate per image, dynamic offset mask, rel-pos embedding ----
    q = jnp.broadcast_to(query[:, None], (N, n_images, Len_q, query.shape[-1]))
    q = linear(q, params["dyn_mask_w"], params["dyn_mask_b"])
    q = q + params["query_relpos"][image_relpos]

    # ---- fused sampling-offset / attention-weight projection (one wider matmul) ----
    n_off = n_heads * n_points * 2
    so_aw_w = jnp.concatenate([params["samp_off_w"], params["attn_w_w"]], axis=1)
    so_aw_b = jnp.concatenate([params["samp_off_b"], params["attn_w_b"]], axis=0)
    so_aw = linear(q, so_aw_w, so_aw_b)
    so = so_aw[..., :n_off]
    aw = so_aw[..., n_off:]

    so = so.reshape(N, n_images, Len_q, n_heads, 1, n_points, 2)
    so = so.transpose(0, 2, 3, 1, 4, 5, 6).reshape(N, Len_q, n_heads, n_images, n_points, 2)

    aw = aw.reshape(N, n_images, Len_q, n_heads, n_levels, n_points + 1)
    aw = aw.transpose(0, 2, 3, 1, 4, 5).reshape(N, Len_q, n_heads, nlevels, n_points + 1)

    # per-level scale ratios
    so = so[:, :, :, :n_images, None] * params["scale_ratios"].reshape(1, 1, 1, 1, n_levels, 1, 1)
    so = so.reshape(N, Len_q, n_heads, nlevels, n_points, 2)

    # ---- attention-mask bias, ignore slot, softmax ----
    am = (1.0 - attention_mask.astype(aw.dtype)) * -10000.0
    am = jnp.repeat(am[:, None, None, :, None], n_levels, axis=3)    # (N,1,1,nlevels,1)
    aw = aw + am
    aw = aw.at[..., -1].set(-math.log(nlevels))
    aw = jax.nn.softmax(aw.reshape(N, Len_q, n_heads, nlevels * (n_points + 1)), axis=-1)
    aw = aw.reshape(N, Len_q, n_heads, nlevels, n_points + 1)
    aw_ignore = aw[..., -1:]
    aw = aw[..., :-1]

    # ---- ignore-token aggregation (parameter frozen at zero; kept for fidelity) ----
    ign = jnp.broadcast_to(params["ignore_token"], (N, Len_q, nlevels, d_v))
    ign = ign.reshape(N, Len_q, nlevels, n_heads, head_dim).transpose(0, 1, 3, 2, 4)
    ign = (ign * aw_ignore).sum(axis=-2).reshape(N, Len_q, d_v)

    # ---- sampling locations (reference_points last dim == 2 path) ----
    # TODO(synk): reference_points with last dim == 4 (reference-box) branch not implemented.
    offset_normalizer = jnp.stack(
        [input_spatial_shapes[:, 1], input_spatial_shapes[:, 0]], -1).astype(so.dtype)
    loc = (reference_points[:, :, None, :, None, :]
           + so / offset_normalizer[None, None, None, :, None, :])
    # loc: (N, Len_q, n_heads, nlevels, n_points, 2)

    # ---- deformable sampling + weighted aggregation ----
    value_t = value.transpose(0, 2, 1, 3)              # (N, n_heads, Len_in, head_dim)
    locx = loc[..., 0].transpose(0, 2, 3, 1, 4)        # (N, n_heads, nlevels, Len_q, P)
    locy = loc[..., 1].transpose(0, 2, 3, 1, 4)
    attw = aw.transpose(0, 2, 3, 1, 4)
    if use_pallas:
        out = msda_pallas(value_t, locx, locy, attw, level_specs)
    else:
        out = msda_reference(value_t, locx, locy, attw, level_specs)
    out = out.transpose(0, 2, 1, 3).reshape(N, Len_q, d_v)

    out = out + ign
    out = linear(out, params["out_proj_w"], params["out_proj_b"])
    return out


# ----------------------------------------------------------------------------
# Deterministic parameter initialization (synthetic — shapes follow MMFS.__init__)
# ----------------------------------------------------------------------------
def init_params(key, cfg):
    d_model = cfg["d_model"]
    d_query = cfg["d_query"]
    d_value = cfg["d_value"]
    d_out = cfg["d_out"]
    n_levels = cfg["n_levels"]
    n_heads = cfg["n_heads"]
    n_points = cfg["n_points"]
    ratio = cfg["ratio"]
    d_v = int(d_model * ratio)
    mag = cfg["offset_init_magnitude"]

    ks = jax.random.split(key, 6)

    def xavier(k, shape):
        limit = math.sqrt(6.0 / (shape[0] + shape[1]))
        return jax.random.uniform(k, shape, jnp.float32, -limit, limit)

    return {
        "samp_off_w": jnp.zeros((d_query, n_heads * n_points * 2), jnp.float32),
        "samp_off_b": jax.random.uniform(ks[0], (n_heads * n_points * 2,),
                                         jnp.float32, -mag, mag),
        "dyn_mask_w": jax.random.normal(ks[1], (d_query, d_query), jnp.float32) * 0.02,
        "dyn_mask_b": jnp.zeros((d_query,), jnp.float32),
        "attn_w_w": jax.random.normal(ks[2], (d_query, n_heads * n_levels * (n_points + 1)),
                                      jnp.float32) * 0.02,
        "attn_w_b": jnp.zeros((n_heads * n_levels * (n_points + 1),), jnp.float32),
        "value_proj_w": xavier(ks[3], (d_value, d_v)),
        "value_proj_b": jnp.zeros((d_v,), jnp.float32),
        "out_proj_w": xavier(ks[4], (d_v, d_out)),
        "out_proj_b": jnp.zeros((d_out,), jnp.float32),
        "query_relpos": jax.random.normal(ks[5], (cfg["max_num_image_per_seq"], d_query),
                                          jnp.float32) * 0.02,
        "ignore_token": jnp.zeros((1, 1, 1, d_v), jnp.float32),
        "scale_ratios": jnp.array([s / cfg["base_spatial_shape"] for s in cfg["spatial_shapes"]],
                                  jnp.float32),
    }


if __name__ == "__main__":
    # Small, consistent configuration (lane-friendly: Len_q and d_* multiples of 128,
    # each level width a multiple of 8, level starts multiples of 128).
    cfg = {
        "d_model": 128, "d_query": 128, "d_value": 128, "d_out": 128,
        "n_levels": 2, "n_heads": 4, "n_points": 4, "ratio": 1.0,
        "offset_init_magnitude": 3,
        "spatial_shapes": [16, 8], "base_spatial_shape": 16,
        "max_num_image_per_seq": 50,
    }
    N, Len_q, n_images = 2, 128, 2
    n_levels = cfg["n_levels"]
    level_hw = [(16, 16), (16, 8)]      # per-image, per-level (H, W); H*W = 256, 128

    # per-image, per-level spatial shapes and start indices (image-major, level-minor)
    level_specs = []
    spatial_rows = []
    start = 0
    for _img in range(n_images):
        for (H, W) in level_hw:
            level_specs.append((H, W, start))
            spatial_rows.append((H, W))
            start += H * W
    cfg["level_specs"] = level_specs
    hw_per_image = sum(H * W for (H, W) in level_hw)
    Len_in = n_images * hw_per_image
    nlevels = n_images * n_levels

    key = jax.random.PRNGKey(0)
    k_par, k_q, k_ref, k_in = jax.random.split(key, 4)
    params = init_params(k_par, cfg)

    query = jax.random.normal(k_q, (N, Len_q, cfg["d_query"]), jnp.float32)
    reference_points = jax.random.uniform(k_ref, (N, Len_q, nlevels, 2), jnp.float32)
    input_flatten = jax.random.normal(k_in, (N, n_images, hw_per_image, cfg["d_value"]),
                                      jnp.float32)
    input_spatial_shapes = jnp.array(spatial_rows, jnp.int32)
    input_level_start_index = jnp.array([ls[2] for ls in level_specs], jnp.int32)
    attention_mask = jnp.array([[True, True], [True, False]])
    input_padding_mask = jnp.zeros((N, n_images, hw_per_image), bool).at[0, 0, :17].set(True)

    out_pallas = mmfs_forward(params, cfg, query, reference_points, input_flatten,
                              input_spatial_shapes, input_level_start_index,
                              attention_mask, input_padding_mask, use_pallas=True)
    out_pallas = jax.block_until_ready(out_pallas)

    out_ref = mmfs_forward(params, cfg, query, reference_points, input_flatten,
                           input_spatial_shapes, input_level_start_index,
                           attention_mask, input_padding_mask, use_pallas=False)
    out_ref = jax.block_until_ready(out_ref)

    # Pallas path uses bf16 MXU operands (fp32 accumulation); reference is pure fp32.
    if not np.allclose(np.asarray(out_pallas), np.asarray(out_ref), atol=2e-2, rtol=5e-2):
        raise AssertionError("Pallas MMFS output mismatch vs. JAX reference")
    print("KERNEL_OK")
</pallas_src>

<mosaic_0001>
module attributes {stable_mosaic.version = 11 : i64} {
  func.func @_linear_kernel(%arg0: i32, %arg1: memref<512x128xf32, #tpu.memory_space<vmem>>, %arg2: memref<128x128xf32, #tpu.memory_space<vmem>>, %arg3: memref<1x128xf32, #tpu.memory_space<vmem>>, %arg4: memref<512x128xf32, #tpu.memory_space<vmem>>) attributes {dimension_semantics = [#tpu.dimension_semantics<parallel>], iteration_bounds = array<i64: 3>, scalar_prefetch = 0 : i64, scratch_operands = 0 : i64, tpu.core_type = #tpu.core_type<tc>, window_params = [{transform_indices = @transform_0, window_bounds = array<i64: 512, 128>}, {pipeline_mode = #tpu.pipeline_mode<synchronous>, transform_indices = @transform_1, window_bounds = array<i64: 128, 128>}, {pipeline_mode = #tpu.pipeline_mode<synchronous>, transform_indices = @transform_2, window_bounds = array<i64: 1, 128>}, {transform_indices = @transform_3, window_bounds = array<i64: 512, 128>}]} {
    %c0 = arith.constant 0 : index
    %c0_0 = arith.constant 0 : index
    %0 = vector.load %arg1[%c0, %c0_0] : memref<512x128xf32, #tpu.memory_space<vmem>>, vector<512x128xf32>
    %1 = arith.truncf %0 : vector<512x128xf32> to vector<512x128xbf16>
    %c0_1 = arith.constant 0 : index
    %c0_2 = arith.constant 0 : index
    %2 = vector.load %arg2[%c0_1, %c0_2] : memref<128x128xf32, #tpu.memory_space<vmem>>, vector<128x128xf32>
    %3 = arith.truncf %2 : vector<128x128xf32> to vector<128x128xbf16>
    %cst = arith.constant dense<0.000000e+00> : vector<512x128xf32>
    %4 = tpu.matmul %1, %3, %cst {dimension_numbers = #tpu.dot_dimension_numbers<[1], [0], [0], [1], [0, 0, 1, 1], [], []>} : vector<512x128xbf16>, vector<128x128xbf16>, vector<512x128xf32> -> vector<512x128xf32>
    %c0_3 = arith.constant 0 : index
    %c0_4 = arith.constant 0 : index
    %5 = vector.load %arg3[%c0_3, %c0_4] : memref<1x128xf32, #tpu.memory_space<vmem>>, vector<1x128xf32>
    %6 = vector.broadcast %5 : vector<1x128xf32> to vector<512x128xf32>
    %7 = arith.addf %4, %6 : vector<512x128xf32>
    %c0_5 = arith.constant 0 : index
    %c0_6 = arith.constant 0 : index
    %8 = vector.load %arg4[%c0_5, %c0_6] : memref<512x128xf32, #tpu.memory_space<vmem>>, vector<512x128xf32>
    tpu.vector_store %arg4[%c0_5, %c0_6], %7 {strides = array<i32>} : memref<512x128xf32, #tpu.memory_space<vmem>>, vector<512x128xf32>,
    return
  }
  func.func @transform_0(%arg0: i32) -> (i32, i32) {
    %c0_i32 = arith.constant 0 : i32
    %c0_i32_0 = arith.constant 0 : i32
    return %arg0, %c0_i32 : i32, i32
  }
  func.func @transform_1(%arg0: i32) -> (i32, i32) {
    %c0_i32 = arith.constant 0 : i32
    %c0_i32_0 = arith.constant 0 : i32
    %c0_i32_1 = arith.constant 0 : i32
    return %c0_i32, %c0_i32_0 : i32, i32
  }
  func.func @transform_2(%arg0: i32) -> (i32, i32) {
    %c0_i32 = arith.constant 0 : i32
    %c0_i32_0 = arith.constant 0 : i32
    %c0_i32_1 = arith.constant 0 : i32
    return %c0_i32, %c0_i32_0 : i32, i32
  }
  func.func @transform_3(%arg0: i32) -> (i32, i32) {
    %c0_i32 = arith.constant 0 : i32
    %c0_i32_0 = arith.constant 0 : i32
    return %arg0, %c0_i32 : i32, i32
  }
}

</mosaic_0001>

<bundles_post_ra>
// kernel: tpu_custom_call.1
= control target key start
LH: loop header
LB: loop body
LE: loop exit
PB: predicated region body
PF: predicated region fallthrough
CT: control target
= control target key end

     0   :  { %8 = vsyncpa [#allocation3], 0  ;;  %s1561_s0 = inlined_call_operand.hbm [shape: f32[1536,128], index: 0, kind: input, shape index: {}]   ;;  %s1562_s1 = inlined_call_operand.hbm [shape: f32[128,128], index: 1, kind: input, shape index: {}]   ;;  %s1563_s2 = inlined_call_operand.vmem [shape: f32[1,128], index: 2, kind: input, shape index: {}]   ;;  %s1564_s3 = inlined_call_operand.hbm [shape: f32[1536,128], index: 3, kind: output, shape index: {}]  }
   0x1   :  { %10 = vsyncpa [#allocation3 + $0x1], 0 }
   0x2   :  { %11 = vsyncpa [#allocation6], 0 }
   0x3   :  { %12 = vsyncpa [#allocation4], 0 }
   0x4   :  { %14 = vsyncpa [#allocation4 + $0x1], 0  ;;  %s1157_s12 = smov 0   ;;  %s1159_s13 = smov 0  }
   0x5   :  { %s1161_s14 = smov 0   ;;  %s1163_s15 = smov 0  }
   0x6 LB: > { %s1178_s16 = sadd.s32 4294967295, %s1128_s15   ;;  %s784_s17 = sadd.s32 4294967294, %s1128_s15   ;;  %s1128_s15 = sphi %s1163_s15, %s1583_s15   ;;  %s1124_s14 = sphi %s1161_s14, %s1582_s14   ;;  %s1120_s13 = sphi %s1159_s13, %s1581_s13   ;;  %s1116_s12 = sphi %s1157_s12, %s1580_s12  }
   0x7   : > { %p40_p0 = scmp.ne.s32.totalorder %s1120_s13, %s1116_s12  ;;  %p1565_p1 = scmp.eq.s32.totalorder %s1178_s16, 0 }
   0x8   : > { %p112_p3 = scmp.eq.s32.totalorder %s784_s17, 2  ;;  %p785_p5 = scmp.ge.s32.totalorder %s1128_s15, 1 }
   0x9   : > { %p1187_p4 = por %p1565_p1, %p40_p0  ;;  %p119_p7 = scmp.lt.s32.totalorder %s1128_s15, 4 }
   0xa   : > { %p1192_p6 = por %p112_p3, %p40_p0  ;;  %s1130_s21 = smov [#allocation5]  }
   0xb   : > { %s1568_s18 = scalar_select %p1187_p4, 1, 0 }
   0xc   : > { %s1569_s19 = scalar_select %p1192_p6, 1, 0 }
   0xd   : > { %p1197_p8 = pnand %p785_p5, %p119_p7  ;;  %s131_s22 = sshll.u32 %s1130_s21, 4  ;;  %s132_s22 = int_to_ptr.vmem [resolvable:$true] %s131_s22 }
   0xe   : > { %s1210_s24 = sadd.s32 1, %s1128_s15   ;;  %s27_s25 = sadd.s32 1, %s1124_s14 }
   0xf   : > { %s1570_s20 = scalar_select %p1197_p8, 1, 0 }
  0x10   : > { %p947_p9 = pneg %p1197_p8  ;;  %s24_s26 = ssub.s32 %s1128_s15, %s1210_s24 }
  0x11   : > { %s1000_s29 = scalar_lea.hbm %s1562_s1, 2048 }
  0x12   : > { %p1205_p10 = pnand %p947_p9, %p1565_p1  ;;  %p1001_p11 = scmp.ne.s32.totalorder %s1562_s1, %s1000_s29 }
  0x13   : > { %p1007_p3 = scmp.lt.u32.totalorder %s1000_s29, %s1562_s1 }
  0x14   : > { %p1002_p12 = pneg %p1205_p10 }
  0x16   : > { %p1003_p13 = pnand %p1002_p12, %p1001_p11 }
  0x18   : > { %p1004_p0 = pneg %p1003_p13 }
  0x1a   : > { %p1009_p5 = pnand %p1007_p3, %p1004_p0 }
  0x1c   : > { %1012 = shalt.err (!%p1009_p5)
}
  0x1d   : > { %s1013_s7 = scalar_lea.vmem %s132_s22, 2048  ;;  %p1021_p2 = scmp.lt.s32.totalorder %s132_s22, %s132_s22 }
  0x1e   : > { %p1014_p7 = scmp.ne.s32.totalorder %s132_s22, %s1013_s7  ;;  %p1022_p6 = scmp.lt.s32.totalorder %s1013_s7, %s1013_s7 }
  0x20   : > { %p1016_p9 = pnand %p1014_p7, %p1002_p12  ;;  %p1023_p4 = por %p1022_p6, %p1021_p2 }
  0x22   : > { %p1017_p1 = pneg %p1016_p9 }
  0x24   : > { %p1024_p8 = pnand %p1023_p4, %p1017_p1 }
  0x26   : > { %1027 = shalt.err (!%p1024_p8)
}
  0x27   : > { %s1131_s8 = smov 128   ;;  %s1132_s9 = smov 8  }
  0x28   : > { %950 = dma.hbm_to_vmem [thread:$0]  (!%p1205_p10), %s1562_s1, 2048, %s132_s22, [#allocation6], %s1131_s8, %s1131_s8, %s1132_s9  }
  0x29   : > { %p25_p1 = scmp.eq.s32.totalorder %s24_s26, 0  ;;  %p34_p2 = scmp.ne.s32.totalorder %s1124_s14, %s1120_s13 }
  0x2a   : > { %p35_p4 = scmp.eq.s32.totalorder %s1128_s15, 0  ;;  %p960_p6 = scmp.lt.s32.totalorder %s1128_s15, 3 }
  0x2b   : > { %s1239_s17 = scalar_select %p25_p1, %s1124_s14, %s27_s25  }
  0x2c   : > { %p36_p8 = por %p35_p4, %p34_p2  ;;  %p1572_p11 = scmp.eq.s32.totalorder %s1178_s16, 2 }
  0x2d   : > { %s148_s23 = sand.u32 1, %s1124_s14   ;;  %s801_s27 = sshll.u32 %s1128_s15, 13 }
  0x2e   : > { %p1243_p12 = por %p1572_p11, %p34_p2  ;;  %s788_s28 = sshll.u32 %s148_s23, 9 }
  0x2f   : > { %s1252_s4 = scalar_lea.hbm %s1561_s0, %s801_s27  ;;  %s152_s22 = scalar_lea.vmem [#allocation2], %s788_s28 }
  0x30   : > { %s159_s25 = sshll.u32 %s152_s22, 4  ;;  %p1254_p10 = pnand %p960_p6, %p36_p8  ;;  %s1258_s25 = int_to_ptr.vmem [resolvable:$true] %s159_s25 }
  0x31   : > { %s1260_s5 = scalar_lea.sflag [#allocation3], %s148_s23  ;;  %s1028_s6 = scalar_lea.hbm %s1252_s4, 8192 }
  0x32   : > { %p1029_p13 = scmp.ne.s32.totalorder %s1252_s4, %s1028_s6  ;;  %p1030_p0 = pneg %p1254_p10 }
  0x33   : > { %s1033_s11 = scalar_lea.hbm %s1561_s0, 24576  ;;  %p1034_p7 = scmp.lt.u32.totalorder %s1252_s4, %s1561_s0 }
  0x34   : > { %p1031_p3 = pnand %p1030_p0, %p1029_p13  ;;  %p1035_p9 = scmp.lt.u32.totalorder %s1033_s11, %s1028_s6 }
  0x35   : > { %p1037_p2 = scmp.lt.u32.totalorder %s1028_s6, %s1252_s4 }
  0x36   : > { %p1032_p5 = pneg %p1031_p3  ;;  %p1036_p1 = por %p1035_p9, %p1034_p7 }
  0x38   : > { %p1038_p4 = por %p1037_p2, %p1036_p1 }
  0x3a   : > { %p1039_p6 = pnand %p1038_p4, %p1032_p5 }
  0x3c   : > { %1042 = shalt.err (!%p1039_p6)
}
  0x3d   : > { %s1043_s23 = scalar_lea.vmem %s1258_s25, 8192  ;;  %s1133_s29 = smov [#allocation2]  }
  0x3e   : > { %p1044_p8 = scmp.ne.s32.totalorder %s1258_s25, %s1043_s23  ;;  %s1048_s30 = sshll.u32 %s1133_s29, 4  ;;  %s1049_s30 = int_to_ptr.vmem [resolvable:$false] %s1048_s30 }
  0x3f   : > { %s1050_s22 = scalar_lea.vmem %s1049_s30, 16384  ;;  %p1051_p3 = scmp.lt.s32.totalorder %s1258_s25, %s1049_s30 }
  0x40   : > { %p1046_p11 = pnand %p1044_p8, %p1030_p0  ;;  %p1052_p7 = scmp.lt.s32.totalorder %s1050_s22, %s1043_s23 }
  0x42   : > { %p1047_p13 = pneg %p1046_p11  ;;  %p1053_p9 = por %p1052_p7, %p1051_p3 }
  0x44   : > { %p1054_p1 = pnand %p1053_p9, %p1047_p13 }
  0x46   : > { %1057 = shalt.err (!%p1054_p1)
}
  0x47   : > { %954 = dma.hbm_to_vmem [thread:$0]  (!%p1254_p10), %s1252_s4, 8192, %s1258_s25, %s1260_s5, %s1131_s8, %s1131_s8, %s1132_s9  }
  0x48   : > { %p1575_p0 = scmp.ne.s32.totalorder %s1570_s20, 0 }
  0x49   : > { %s1294_s6 = sand.u32 (!%p1575_p0), 1, %s1120_s13   ;;  %p1576_p5 = scmp.ne.s32.totalorder (!%p1575_p0), %s1568_s18, 0 }
  0x4a   : > { %171 = sbr.rel (%p1575_p0) target bundleno = 408 (0x198), region = 32  ;;  %s792_s7 = sshll.u32 (!%p1575_p0), %s1294_s6, 9 }
  0x4b   : > { %s174_s10 = scalar_lea.sflag (!%p1575_p0), [#allocation3], %s1294_s6  ;;  %s1300_s26 = scalar_lea.vmem (!%p1575_p0), [#allocation2], %s792_s7 }
  0x51   : > { %1103 = dma.done.wait (%p1576_p5), %s174_s10, 8192  }
  0x52   : > { %1105 = vsyncadd (%p1576_p5), %s174_s10, 4294959104  ;;  %p1577_p10 = scmp.eq.s32.totalorder %s1178_s16, 0 }
  0x54   : > { %1107 = dma.done.wait (%p1577_p10), [#allocation6], 2048   ;;  %p1578_p2 = pmov %p1577_p10 }
  0x55   : > { %v303_v0 = vld [vmem:[#allocation5] sm:$0xff]  ;;  %v304_v1 = vld [vmem:[#allocation5 + $0x8] sm:$0xff]  ;;  %v305_v2 = vld [vmem:[#allocation5 + $0x10] sm:$0xff]  ;;  %s1385_s8 = scalar_lea.vmem [#allocation7], %s792_s7  ;;  %s802_s9 = sshll.u32 %s1178_s16, 13 }
  0x56   : > { %1109 = vsyncadd (%p1578_p2), [#allocation6], 4294965248  ;;  %v319_v3 = vpack.c.bf16 %v304_v1, %v303_v0  ;;  %v306_v4 = vld [vmem:[#allocation5 + $0x18] sm:$0xff]  ;;  %v307_v6 = vld [vmem:[#allocation5 + $0x20] sm:$0xff]  ;;  %s701_s4 = sshll.u32 %s1385_s8, 4  ;;  %s1508_s5 = scalar_lea.hbm %s1564_s3, %s802_s9  ;;  %s1510_s4 = int_to_ptr.vmem [resolvable:$true] %s701_s4 }
  0x57   : > { %v320_v5 = vpack.c.bf16 %v306_v4, %v305_v2  ;;  %v308_v7 = vld [vmem:[#allocation5 + $0x28] sm:$0xff]  ;;  %v309_v9 = vld [vmem:[#allocation5 + $0x30] sm:$0xff]  ;;  %v207_v10 = vld [vmem:[%s1300_s26] sm:$0xff]  ;;  %s688_s11 = scalar_lea.sflag [#allocation4], %s1294_s6  ;;  %s1058_s27 = scalar_lea.vmem %s1510_s4, 8192 }
  0x58   : > { %843 = vmatprep.subr.bf16.mxu0 %v319_v3  ;;  %923 = vmatprep.subr.bf16.mxu1 %v319_v3  ;;  %v321_v8 = vpack.c.bf16 %v308_v7, %v307_v6  ;;  %v208_v11 = vld [vmem:[%s1300_s26 + $0x8] sm:$0xff]  ;;  %v310_v12 = vld [vmem:[#allocation5 + $0x38] sm:$0xff]  ;;  %v239_v14 = vld [vmem:[%s1300_s26 + $0x100] sm:$0xff]  ;;  %p1059_p4 = scmp.ne.s32.totalorder %s1510_s4, %s1058_s27  ;;  %s1134_s28 = smov [#allocation7]  }
  0x59   : > { %844 = vmatpush3.bf16.msra.mxu0 %v319_v3  ;;  %931 = vmatpush3.bf16.msra.mxu1 %v319_v3  ;;  %v271_v13 = vpack.c.bf16 %v208_v11, %v207_v10  ;;  %v240_v15 = vld [vmem:[%s1300_s26 + $0x108] sm:$0xff]  ;;  %v322_v17 = vpack.c.bf16 %v310_v12, %v309_v9  ;;  %v311_v18 = vld [vmem:[#allocation5 + $0x40] sm:$0xff]  ;;  %v313_v21 = vld [vmem:[#allocation5 + $0x50] sm:$0xff]  ;;  %s1062_s23 = sshll.u32 %s1134_s28, 4  ;;  %s1063_s23 = int_to_ptr.vmem [resolvable:$false] %s1062_s23 }
  0x5a   : > { %845 = vmatprep.subr.bf16.mxu0 %v320_v5  ;;  %924 = vmatprep.subr.bf16.mxu1 %v320_v5  ;;  %v287_v16 = vpack.c.bf16 %v240_v15, %v239_v14  ;;  %v312_v19 = vld [vmem:[#allocation5 + $0x48] sm:$0xff]  ;;  %v314_v22 = vld [vmem:[#allocation5 + $0x58] sm:$0xff]  ;;  %v315_v24 = vld [vmem:[#allocation5 + $0x60] sm:$0xff]  ;;  %p1060_p6 = pnand %p1059_p4, %p1243_p12  ;;  %s1064_s29 = scalar_lea.vmem %s1063_s23, 16384 }
  0x5b   : > { %859 = vmatprep.mubr.bf16.mxu0 %v271_v13  ;;  %v323_v20 = vpack.c.bf16 %v312_v19, %v311_v18  ;;  %v324_v23 = vpack.c.bf16 %v314_v22, %v313_v21  ;;  %v316_v25 = vld [vmem:[#allocation5 + $0x68] sm:$0xff]  ;;  %v317_v27 = vld [vmem:[#allocation5 + $0x70] sm:$0xff]  ;;  %v318_v28 = vld [vmem:[#allocation5 + $0x78] sm:$0xff]  ;;  %p1065_p11 = scmp.lt.s32.totalorder %s1510_s4, %s1063_s23  ;;  %p1066_p13 = scmp.lt.s32.totalorder %s1064_s29, %s1058_s27 }
  0x5c   : > { %891 = vmatprep.mubr.bf16.mxu1 %v287_v16  ;;  %v325_v26 = vpack.c.bf16 %v316_v25, %v315_v24  ;;  %v326_v29 = vpack.c.bf16 %v318_v28, %v317_v27  ;;  %v209_v30 = vld [vmem:[%s1300_s26 + $0x10] sm:$0xff]  ;;  %v210_v31 = vld [vmem:[%s1300_s26 + $0x18] sm:$0xff]  ;;  %v211_v34 = vld [vmem:[%s1300_s26 + $0x20] sm:$0xff]  ;;  %p1061_p8 = pneg %p1060_p6 }
  0x5d   : > { %846 = vmatpush3.bf16.msra.mxu0 %v320_v5  ;;  %932 = vmatpush3.bf16.msra.mxu1 %v320_v5  ;;  %v241_v32 = vld [vmem:[%s1300_s26 + $0x110] sm:$0xff]  ;;  %v242_v33 = vld [vmem:[%s1300_s26 + $0x118] sm:$0xff]  ;;  %v212_v35 = vld [vmem:[%s1300_s26 + $0x28] sm:$0xff]  ;;  %v272_v38 = vpack.c.bf16 %v210_v31, %v209_v30  ;;  %p1067_p3 = por %p1066_p13, %p1065_p11 }
  0x5e   : > { %847 = vmatprep.subr.bf16.mxu0 %v321_v8  ;;  %925 = vmatprep.subr.bf16.mxu1 %v321_v8  ;;  %v243_v36 = vld [vmem:[%s1300_s26 + $0x120] sm:$0xff]  ;;  %v244_v37 = vld [vmem:[%s1300_s26 + $0x128] sm:$0xff]  ;;  %v288_v39 = vpack.c.bf16 %v242_v33, %v241_v32  ;;  %v273_v40 = vpack.c.bf16 %v212_v35, %v211_v34  ;;  %v213_v42 = vld [vmem:[%s1300_s26 + $0x30] sm:$0xff] }
  0x5f   : > { %v289_v41 = vpack.c.bf16 %v244_v37, %v243_v36  ;;  %v214_v43 = vld [vmem:[%s1300_s26 + $0x38] sm:$0xff]  ;;  %v245_v44 = vld [vmem:[%s1300_s26 + $0x130] sm:$0xff]  ;;  %v215_v46 = vld [vmem:[%s1300_s26 + $0x40] sm:$0xff]  ;;  %p1068_p7 = pnand %p1067_p3, %p1061_p8 }
  0x60   : > { %v246_v45 = vld [vmem:[%s1300_s26 + $0x138] sm:$0xff]  ;;  %v216_v47 = vld [vmem:[%s1300_s26 + $0x48] sm:$0xff]  ;;  %v247_v48 = vld [vmem:[%s1300_s26 + $0x140] sm:$0xff]  ;;  %v274_v50 = vpack.c.bf16 %v214_v43, %v213_v42 }
  0x61   : > { %848 = vmatpush3.bf16.msra.mxu0 %v321_v8  ;;  %933 = vmatpush3.bf16.msra.mxu1 %v321_v8  ;;  %v248_v49 = vld [vmem:[%s1300_s26 + $0x148] sm:$0xff]  ;;  %v290_v51 = vpack.c.bf16 %v246_v45, %v245_v44  ;;  %v275_v52 = vpack.c.bf16 %v216_v47, %v215_v46  ;;  %v217_v54 = vld [vmem:[%s1300_s26 + $0x50] sm:$0xff]  ;;  %v218_v55 = vld [vmem:[%s1300_s26 + $0x58] sm:$0xff] }
  0x62   : > { %849 = vmatprep.subr.bf16.mxu0 %v322_v17  ;;  %926 = vmatprep.subr.bf16.mxu1 %v322_v17  ;;  %v291_v53 = vpack.c.bf16 %v248_v49, %v247_v48  ;;  %v249_v56 = vld [vmem:[%s1300_s26 + $0x150] sm:$0xff]  ;;  %v250_v57 = vld [vmem:[%s1300_s26 + $0x158] sm:$0xff]  ;;  %v219_v58 = vld [vmem:[%s1300_s26 + $0x60] sm:$0xff]  ;;  %v276_v62 = vpack.c.bf16 %v218_v55, %v217_v54 }
  0x63   : > { %v220_v59 = vld [vmem:[%s1300_s26 + $0x68] sm:$0xff]  ;;  %v251_v60 = vld [vmem:[%s1300_s26 + $0x160] sm:$0xff]  ;;  %v292_v63 = vpack.c.bf16 %v250_v57, %v249_v56  ;;  %v221_v2 = vld [vmem:[%s1300_s26 + $0x70] sm:$0xff] }
  0x64   : > { %v252_v61 = vld [vmem:[%s1300_s26 + $0x168] sm:$0xff]  ;;  %v277_v0 = vpack.c.bf16 %v220_v59, %v219_v58  ;;  %v222_v3 = vld [vmem:[%s1300_s26 + $0x78] sm:$0xff]  ;;  %v253_v4 = vld [vmem:[%s1300_s26 + $0x170] sm:$0xff] }
  0x65   : > { %850 = vmatpush3.bf16.msra.mxu0 %v322_v17  ;;  %934 = vmatpush3.bf16.msra.mxu1 %v322_v17  ;;  %v293_v1 = vpack.c.bf16 %v252_v61, %v251_v60  ;;  %v254_v5 = vld [vmem:[%s1300_s26 + $0x178] sm:$0xff]  ;;  %v223_v6 = vld [vmem:[%s1300_s26 + $0x80] sm:$0xff]  ;;  %v224_v7 = vld [vmem:[%s1300_s26 + $0x88] sm:$0xff]  ;;  %v278_v10 = vpack.c.bf16 %v222_v3, %v221_v2 }
  0x66   : > { %851 = vmatprep.subr.bf16.mxu0 %v323_v20  ;;  %927 = vmatprep.subr.bf16.mxu1 %v323_v20  ;;  %v255_v8 = vld [vmem:[%s1300_s26 + $0x180] sm:$0xff]  ;;  %v256_v9 = vld [vmem:[%s1300_s26 + $0x188] sm:$0xff]  ;;  %v294_v11 = vpack.c.bf16 %v254_v5, %v253_v4  ;;  %v279_v12 = vpack.c.bf16 %v224_v7, %v223_v6  ;;  %v225_v14 = vld [vmem:[%s1300_s26 + $0x90] sm:$0xff] }
  0x67   : > { %v295_v13 = vpack.c.bf16 %v256_v9, %v255_v8  ;;  %v226_v15 = vld [vmem:[%s1300_s26 + $0x98] sm:$0xff]  ;;  %v257_v16 = vld [vmem:[%s1300_s26 + $0x190] sm:$0xff]  ;;  %v227_v18 = vld [vmem:[%s1300_s26 + $0xa0] sm:$0xff] }
  0x68   : > { %v258_v17 = vld [vmem:[%s1300_s26 + $0x198] sm:$0xff]  ;;  %v228_v19 = vld [vmem:[%s1300_s26 + $0xa8] sm:$0xff]  ;;  %v280_v22 = vpack.c.bf16 %v226_v15, %v225_v14  ;;  %v261_v28 = vld [vmem:[%s1300_s26 + $0x1b0] sm:$0xff] }
  0x69   : > { %852 = vmatpush3.bf16.msra.mxu0 %v323_v20  ;;  %935 = vmatpush3.bf16.msra.mxu1 %v323_v20  ;;  %v259_v20 = vld [vmem:[%s1300_s26 + $0x1a0] sm:$0xff]  ;;  %v260_v21 = vld [vmem:[%s1300_s26 + $0x1a8] sm:$0xff]  ;;  %v281_v24 = vpack.c.bf16 %v228_v19, %v227_v18  ;;  %v230_v27 = vld [vmem:[%s1300_s26 + $0xb8] sm:$0xff] }
  0x6a   : > { %853 = vmatprep.subr.bf16.mxu0 %v324_v23  ;;  %928 = vmatprep.subr.bf16.mxu1 %v324_v23  ;;  %v297_v25 = vpack.c.bf16 %v260_v21, %v259_v20  ;;  %v231_v30 = vld [vmem:[%s1300_s26 + $0xc0] sm:$0xff]  ;;  %v232_v31 = vld [vmem:[%s1300_s26 + $0xc8] sm:$0xff] }
  0x6b   : > { %v263_v32 = vld [vmem:[%s1300_s26 + $0x1c0] sm:$0xff]  ;;  %v264_v33 = vld [vmem:[%s1300_s26 + $0x1c8] sm:$0xff]  ;;  %v283_v36 = vpack.c.bf16 %v232_v31, %v231_v30 }
  0x6c   : > { %v299_v37 = vpack.c.bf16 %v264_v33, %v263_v32  ;;  %v235_v42 = vld [vmem:[%s1300_s26 + $0xe0] sm:$0xff]  ;;  %v236_v43 = vld [vmem:[%s1300_s26 + $0xe8] sm:$0xff] }
  0x6d   : > { %854 = vmatpush3.bf16.msra.mxu0 %v324_v23  ;;  %936 = vmatpush3.bf16.msra.mxu1 %v324_v23  ;;  %v296_v23 = vpack.c.bf16 %v258_v17, %v257_v16  ;;  %v267_v44 = vld [vmem:[%s1300_s26 + $0x1e0] sm:$0xff]  ;;  %v268_v45 = vld [vmem:[%s1300_s26 + $0x1e8] sm:$0xff]  ;;  %v285_v48 = vpack.c.bf16 %v236_v43, %v235_v42 }
  0x6e   : > { %855 = vmatprep.subr.bf16.mxu0 %v325_v26  ;;  %929 = vmatprep.subr.bf16.mxu1 %v325_v26  ;;  %v301_v49 = vpack.c.bf16 %v268_v45, %v267_v44  ;;  %v1377_v56 = vld [vmem:[%s1563_s2] ss:$0 sm:$0xff] }
  0x71   : > { %856 = vmatpush3.bf16.msra.mxu0 %v325_v26  ;;  %937 = vmatpush3.bf16.msra.mxu1 %v325_v26  ;;  %v229_v26 = vld [vmem:[%s1300_s26 + $0xb0] sm:$0xff] }
  0x72   : > { %857 = vmatprep.subr.bf16.mxu0 %v326_v29  ;;  %930 = vmatprep.subr.bf16.mxu1 %v326_v29  ;;  %v282_v34 = vpack.c.bf16 %v230_v27, %v229_v26 }
  0x75   : > { %858 = vmatpush3.bf16.msra.mxu0 %v326_v29  ;;  %938 = vmatpush3.bf16.msra.mxu1 %v326_v29  ;;  %v262_v29 = vld [vmem:[%s1300_s26 + $0x1b8] sm:$0xff] }
  0x76   : > { %v298_v35 = vpack.c.bf16 %v262_v29, %v261_v28 }
  0x78   : > { %860 = vmatmul.mubr.bf16.vlgmr.msra.gmra.mrb[0].mxu0 %v272_v38  ;;  %892 = vmatmul.mubr.bf16.vlgmr.msra.gmra.mrb[0].mxu1 %v288_v39  ;;  %v233_v38 = vld [vmem:[%s1300_s26 + $0xd0] sm:$0xff]  ;;  %v234_v39 = vld [vmem:[%s1300_s26 + $0xd8] sm:$0xff] }
  0x79   : > { %863 = vmatprep.mubr.bf16.mxu0 %v273_v40  ;;  %895 = vmatprep.mubr.bf16.mxu1 %v289_v41  ;;  %v265_v40 = vld [vmem:[%s1300_s26 + $0x1d0] sm:$0xff]  ;;  %v266_v41 = vld [vmem:[%s1300_s26 + $0x1d8] sm:$0xff]  ;;  %v284_v46 = vpack.c.bf16 %v234_v39, %v233_v38 }
  0x7a   : > { %v300_v47 = vpack.c.bf16 %v266_v41, %v265_v40 }
  0x80   : > { %864 = vmatmul.mubr.bf16.gmra.mrb[4].mxu0 %v274_v50  ;;  %896 = vmatmul.mubr.bf16.gmra.mrb[4].mxu1 %v290_v51  ;;  %v237_v50 = vld [vmem:[%s1300_s26 + $0xf0] sm:$0xff]  ;;  %v238_v51 = vld [vmem:[%s1300_s26 + $0xf8] sm:$0xff] }
  0x81   : > { %867 = vmatprep.mubr.bf16.mxu0 %v275_v52  ;;  %899 = vmatprep.mubr.bf16.mxu1 %v291_v53  ;;  %v269_v52 = vld [vmem:[%s1300_s26 + $0x1f0] sm:$0xff]  ;;  %v270_v53 = vld [vmem:[%s1300_s26 + $0x1f8] sm:$0xff]  ;;  %v286_v54 = vpack.c.bf16 %v238_v51, %v237_v50 }
  0x82   : > { %v302_v55 = vpack.c.bf16 %v270_v53, %v269_v52 }
  0x88   : > { %868 = vmatmul.mubr.bf16.gmra.mrb[8].mxu0 %v276_v62  ;;  %900 = vmatmul.mubr.bf16.gmra.mrb[8].mxu1 %v292_v63 }
  0x89   : > { %871 = vmatprep.mubr.bf16.mxu0 %v277_v0  ;;  %903 = vmatprep.mubr.bf16.mxu1 %v293_v1 }
  0x90   : > { %872 = vmatmul.mubr.bf16.gmra.mrb[12].mxu0 %v278_v10  ;;  %904 = vmatmul.mubr.bf16.gmra.mrb[12].mxu1 %v294_v11 }
  0x91   : > { %875 = vmatprep.mubr.bf16.mxu0 %v279_v12  ;;  %907 = vmatprep.mubr.bf16.mxu1 %v295_v13 }
  0x98   : > { %876 = vmatmul.mubr.bf16.gmra.mrb[16].mxu0 %v280_v22  ;;  %908 = vmatmul.mubr.bf16.gmra.mrb[16].mxu1 %v296_v23 }
  0x99   : > { %879 = vmatprep.mubr.bf16.mxu0 %v281_v24  ;;  %911 = vmatprep.mubr.bf16.mxu1 %v297_v25 }
  0xa0   : > { %880 = vmatmul.mubr.bf16.gmra.mrb[20].mxu0 %v282_v34  ;;  %912 = vmatmul.mubr.bf16.gmra.mrb[20].mxu1 %v298_v35 }
  0xa1   : > { %883 = vmatprep.mubr.bf16.mxu0 %v283_v36  ;;  %915 = vmatprep.mubr.bf16.mxu1 %v299_v37 }
  0xa8   : > { %884 = vmatmul.mubr.bf16.gmra.mrb[24].mxu0 %v284_v46  ;;  %916 = vmatmul.mubr.bf16.gmra.mrb[24].mxu1 %v300_v47 }
  0xa9   : > { %887 = vmatprep.mubr.bf16.mxu0 %v285_v48  ;;  %919 = vmatprep.mubr.bf16.mxu1 %v301_v49 }
  0xb0   : > { %888 = vmatmul.mubr.bf16.gmra.mrb[28].mxu0 %v286_v54  ;;  %920 = vmatmul.mubr.bf16.gmra.mrb[28].mxu1 %v302_v55 }
 0x14b   : > { %v861_v57 = vpop.f32.mrb[0].mxu0  ;;  %v893_v58 = vpop.f32.mrb[0].mxu1 }
 0x14c   : > { %v377_v59 = vadd.f32 %v861_v57, %v1377_v56  ;;  %v505_v60 = vadd.f32 %v893_v58, %v1377_v56  ;;  %v368_v61 = vpop.f32.mrb[1].mxu0  ;;  %v496_v62 = vpop.f32.mrb[1].mxu1 }
 0x14d   : > { %v369_v63 = vadd.f32 %v1377_v56, %v368_v61  ;;  %v497_v0 = vadd.f32 %v1377_v56, %v496_v62  ;;  %v862_v1 = vpop.f32.mrb[2].mxu0  ;;  %v894_v2 = vpop.f32.mrb[2].mxu1 }
 0x14e   : > { %625 = vst [vmem:[%s1385_s8 + $0x10] sm:$0xff] %v377_v59  ;;  %657 = vst [vmem:[%s1385_s8 + $0x110] sm:$0xff] %v505_v60  ;;  %v380_v3 = vadd.f32 %v862_v1, %v1377_v56  ;;  %v508_v4 = vadd.f32 %v894_v2, %v1377_v56  ;;  %v371_v5 = vpop.f32.mrb[3].mxu0  ;;  %v499_v6 = vpop.f32.mrb[3].mxu1 }
 0x14f   : > { %623 = vst [vmem:[%s1385_s8] sm:$0xff] %v369_v63  ;;  %655 = vst [vmem:[%s1385_s8 + $0x100] sm:$0xff] %v497_v0  ;;  %v372_v7 = vadd.f32 %v1377_v56, %v371_v5  ;;  %v500_v8 = vadd.f32 %v1377_v56, %v499_v6 }
 0x150   : > { %626 = vst [vmem:[%s1385_s8 + $0x18] sm:$0xff] %v380_v3  ;;  %658 = vst [vmem:[%s1385_s8 + $0x118] sm:$0xff] %v508_v4 }
 0x151   : > { %624 = vst [vmem:[%s1385_s8 + $0x8] sm:$0xff] %v372_v7  ;;  %656 = vst [vmem:[%s1385_s8 + $0x108] sm:$0xff] %v500_v8 }
 0x153   : > { %v865_v9 = vpop.f32.mrb[4].mxu0  ;;  %v897_v10 = vpop.f32.mrb[4].mxu1 }
 0x154   : > { %v393_v11 = vadd.f32 %v865_v9, %v1377_v56  ;;  %v521_v12 = vadd.f32 %v897_v10, %v1377_v56  ;;  %v384_v13 = vpop.f32.mrb[5].mxu0  ;;  %v512_v14 = vpop.f32.mrb[5].mxu1 }
 0x155   : > { %v385_v15 = vadd.f32 %v1377_v56, %v384_v13  ;;  %v513_v16 = vadd.f32 %v1377_v56, %v512_v14  ;;  %v866_v17 = vpop.f32.mrb[6].mxu0  ;;  %v898_v18 = vpop.f32.mrb[6].mxu1 }
 0x156   : > { %629 = vst [vmem:[%s1385_s8 + $0x30] sm:$0xff] %v393_v11  ;;  %661 = vst [vmem:[%s1385_s8 + $0x130] sm:$0xff] %v521_v12  ;;  %v396_v19 = vadd.f32 %v866_v17, %v1377_v56  ;;  %v524_v20 = vadd.f32 %v898_v18, %v1377_v56  ;;  %v387_v21 = vpop.f32.mrb[7].mxu0  ;;  %v515_v22 = vpop.f32.mrb[7].mxu1 }
 0x157   : > { %627 = vst [vmem:[%s1385_s8 + $0x20] sm:$0xff] %v385_v15  ;;  %659 = vst [vmem:[%s1385_s8 + $0x120] sm:$0xff] %v513_v16  ;;  %v388_v23 = vadd.f32 %v1377_v56, %v387_v21  ;;  %v516_v24 = vadd.f32 %v1377_v56, %v515_v22 }
 0x158   : > { %630 = vst [vmem:[%s1385_s8 + $0x38] sm:$0xff] %v396_v19  ;;  %662 = vst [vmem:[%s1385_s8 + $0x138] sm:$0xff] %v524_v20 }
 0x159   : > { %628 = vst [vmem:[%s1385_s8 + $0x28] sm:$0xff] %v388_v23  ;;  %660 = vst [vmem:[%s1385_s8 + $0x128] sm:$0xff] %v516_v24 }
 0x15b   : > { %v869_v25 = vpop.f32.mrb[8].mxu0  ;;  %v901_v26 = vpop.f32.mrb[8].mxu1 }
 0x15c   : > { %v409_v27 = vadd.f32 %v869_v25, %v1377_v56  ;;  %v537_v28 = vadd.f32 %v901_v26, %v1377_v56  ;;  %v400_v29 = vpop.f32.mrb[9].mxu0  ;;  %v528_v30 = vpop.f32.mrb[9].mxu1 }
 0x15d   : > { %v401_v31 = vadd.f32 %v1377_v56, %v400_v29  ;;  %v529_v32 = vadd.f32 %v1377_v56, %v528_v30  ;;  %v870_v33 = vpop.f32.mrb[10].mxu0  ;;  %v902_v34 = vpop.f32.mrb[10].mxu1 }
 0x15e   : > { %633 = vst [vmem:[%s1385_s8 + $0x50] sm:$0xff] %v409_v27  ;;  %665 = vst [vmem:[%s1385_s8 + $0x150] sm:$0xff] %v537_v28  ;;  %v412_v35 = vadd.f32 %v870_v33, %v1377_v56  ;;  %v540_v36 = vadd.f32 %v902_v34, %v1377_v56  ;;  %v403_v37 = vpop.f32.mrb[11].mxu0  ;;  %v531_v38 = vpop.f32.mrb[11].mxu1 }
 0x15f   : > { %631 = vst [vmem:[%s1385_s8 + $0x40] sm:$0xff] %v401_v31  ;;  %663 = vst [vmem:[%s1385_s8 + $0x140] sm:$0xff] %v529_v32  ;;  %v404_v39 = vadd.f32 %v1377_v56, %v403_v37  ;;  %v532_v40 = vadd.f32 %v1377_v56, %v531_v38 }
 0x160   : > { %634 = vst [vmem:[%s1385_s8 + $0x58] sm:$0xff] %v412_v35  ;;  %666 = vst [vmem:[%s1385_s8 + $0x158] sm:$0xff] %v540_v36 }
 0x161   : > { %632 = vst [vmem:[%s1385_s8 + $0x48] sm:$0xff] %v404_v39  ;;  %664 = vst [vmem:[%s1385_s8 + $0x148] sm:$0xff] %v532_v40 }
 0x163   : > { %v873_v41 = vpop.f32.mrb[12].mxu0  ;;  %v905_v42 = vpop.f32.mrb[12].mxu1 }
 0x164   : > { %v425_v43 = vadd.f32 %v873_v41, %v1377_v56  ;;  %v553_v44 = vadd.f32 %v905_v42, %v1377_v56  ;;  %v416_v45 = vpop.f32.mrb[13].mxu0  ;;  %v544_v46 = vpop.f32.mrb[13].mxu1 }
 0x165   : > { %v417_v47 = vadd.f32 %v1377_v56, %v416_v45  ;;  %v545_v48 = vadd.f32 %v1377_v56, %v544_v46  ;;  %v874_v49 = vpop.f32.mrb[14].mxu0  ;;  %v906_v50 = vpop.f32.mrb[14].mxu1 }
 0x166   : > { %637 = vst [vmem:[%s1385_s8 + $0x70] sm:$0xff] %v425_v43  ;;  %669 = vst [vmem:[%s1385_s8 + $0x170] sm:$0xff] %v553_v44  ;;  %v428_v51 = vadd.f32 %v874_v49, %v1377_v56  ;;  %v556_v52 = vadd.f32 %v906_v50, %v1377_v56  ;;  %v419_v53 = vpop.f32.mrb[15].mxu0  ;;  %v547_v54 = vpop.f32.mrb[15].mxu1 }
 0x167   : > { %635 = vst [vmem:[%s1385_s8 + $0x60] sm:$0xff] %v417_v47  ;;  %667 = vst [vmem:[%s1385_s8 + $0x160] sm:$0xff] %v545_v48  ;;  %v420_v55 = vadd.f32 %v1377_v56, %v419_v53  ;;  %v548_v57 = vadd.f32 %v1377_v56, %v547_v54 }
 0x168   : > { %638 = vst [vmem:[%s1385_s8 + $0x78] sm:$0xff] %v428_v51  ;;  %670 = vst [vmem:[%s1385_s8 + $0x178] sm:$0xff] %v556_v52 }
 0x169   : > { %636 = vst [vmem:[%s1385_s8 + $0x68] sm:$0xff] %v420_v55  ;;  %668 = vst [vmem:[%s1385_s8 + $0x168] sm:$0xff] %v548_v57 }
 0x16b   : > { %v877_v58 = vpop.f32.mrb[16].mxu0  ;;  %v909_v59 = vpop.f32.mrb[16].mxu1 }
 0x16c   : > { %v441_v60 = vadd.f32 %v877_v58, %v1377_v56  ;;  %v569_v61 = vadd.f32 %v909_v59, %v1377_v56  ;;  %v432_v62 = vpop.f32.mrb[17].mxu0  ;;  %v560_v63 = vpop.f32.mrb[17].mxu1 }
 0x16d   : > { %v433_v0 = vadd.f32 %v1377_v56, %v432_v62  ;;  %v561_v1 = vadd.f32 %v1377_v56, %v560_v63  ;;  %v878_v2 = vpop.f32.mrb[18].mxu0  ;;  %v910_v3 = vpop.f32.mrb[18].mxu1 }
 0x16e   : > { %641 = vst [vmem:[%s1385_s8 + $0x90] sm:$0xff] %v441_v60  ;;  %673 = vst [vmem:[%s1385_s8 + $0x190] sm:$0xff] %v569_v61  ;;  %v444_v4 = vadd.f32 %v878_v2, %v1377_v56  ;;  %v572_v5 = vadd.f32 %v910_v3, %v1377_v56  ;;  %v435_v6 = vpop.f32.mrb[19].mxu0  ;;  %v563_v7 = vpop.f32.mrb[19].mxu1 }
 0x16f   : > { %639 = vst [vmem:[%s1385_s8 + $0x80] sm:$0xff] %v433_v0  ;;  %671 = vst [vmem:[%s1385_s8 + $0x180] sm:$0xff] %v561_v1  ;;  %v436_v8 = vadd.f32 %v1377_v56, %v435_v6  ;;  %v564_v9 = vadd.f32 %v1377_v56, %v563_v7 }
 0x170   : > { %642 = vst [vmem:[%s1385_s8 + $0x98] sm:$0xff] %v444_v4  ;;  %674 = vst [vmem:[%s1385_s8 + $0x198] sm:$0xff] %v572_v5 }
 0x171   : > { %640 = vst [vmem:[%s1385_s8 + $0x88] sm:$0xff] %v436_v8  ;;  %672 = vst [vmem:[%s1385_s8 + $0x188] sm:$0xff] %v564_v9 }
 0x173   : > { %v881_v10 = vpop.f32.mrb[20].mxu0  ;;  %v913_v11 = vpop.f32.mrb[20].mxu1 }
 0x174   : > { %v457_v12 = vadd.f32 %v881_v10, %v1377_v56  ;;  %v585_v13 = vadd.f32 %v913_v11, %v1377_v56  ;;  %v448_v14 = vpop.f32.mrb[21].mxu0  ;;  %v576_v15 = vpop.f32.mrb[21].mxu1 }
 0x175   : > { %v449_v16 = vadd.f32 %v1377_v56, %v448_v14  ;;  %v577_v17 = vadd.f32 %v1377_v56, %v576_v15  ;;  %v882_v18 = vpop.f32.mrb[22].mxu0  ;;  %v914_v19 = vpop.f32.mrb[22].mxu1 }
 0x176   : > { %645 = vst [vmem:[%s1385_s8 + $0xb0] sm:$0xff] %v457_v12  ;;  %677 = vst [vmem:[%s1385_s8 + $0x1b0] sm:$0xff] %v585_v13  ;;  %v460_v20 = vadd.f32 %v882_v18, %v1377_v56  ;;  %v588_v21 = vadd.f32 %v914_v19, %v1377_v56  ;;  %v451_v22 = vpop.f32.mrb[23].mxu0  ;;  %v579_v23 = vpop.f32.mrb[23].mxu1 }
 0x177   : > { %643 = vst [vmem:[%s1385_s8 + $0xa0] sm:$0xff] %v449_v16  ;;  %675 = vst [vmem:[%s1385_s8 + $0x1a0] sm:$0xff] %v577_v17  ;;  %v452_v24 = vadd.f32 %v1377_v56, %v451_v22  ;;  %v580_v25 = vadd.f32 %v1377_v56, %v579_v23 }
 0x178   : > { %646 = vst [vmem:[%s1385_s8 + $0xb8] sm:$0xff] %v460_v20  ;;  %678 = vst [vmem:[%s1385_s8 + $0x1b8] sm:$0xff] %v588_v21 }
 0x179   : > { %644 = vst [vmem:[%s1385_s8 + $0xa8] sm:$0xff] %v452_v24  ;;  %676 = vst [vmem:[%s1385_s8 + $0x1a8] sm:$0xff] %v580_v25 }
 0x17b   : > { %v885_v26 = vpop.f32.mrb[24].mxu0  ;;  %v917_v27 = vpop.f32.mrb[24].mxu1 }
 0x17c   : > { %v473_v28 = vadd.f32 %v885_v26, %v1377_v56  ;;  %v601_v29 = vadd.f32 %v917_v27, %v1377_v56  ;;  %v464_v30 = vpop.f32.mrb[25].mxu0  ;;  %v592_v31 = vpop.f32.mrb[25].mxu1 }
 0x17d   : > { %v465_v32 = vadd.f32 %v1377_v56, %v464_v30  ;;  %v593_v33 = vadd.f32 %v1377_v56, %v592_v31  ;;  %v886_v34 = vpop.f32.mrb[26].mxu0  ;;  %v918_v35 = vpop.f32.mrb[26].mxu1 }
 0x17e   : > { %649 = vst [vmem:[%s1385_s8 + $0xd0] sm:$0xff] %v473_v28  ;;  %681 = vst [vmem:[%s1385_s8 + $0x1d0] sm:$0xff] %v601_v29  ;;  %v476_v36 = vadd.f32 %v886_v34, %v1377_v56  ;;  %v604_v37 = vadd.f32 %v918_v35, %v1377_v56  ;;  %v467_v38 = vpop.f32.mrb[27].mxu0  ;;  %v595_v39 = vpop.f32.mrb[27].mxu1 }
 0x17f   : > { %647 = vst [vmem:[%s1385_s8 + $0xc0] sm:$0xff] %v465_v32  ;;  %679 = vst [vmem:[%s1385_s8 + $0x1c0] sm:$0xff] %v593_v33  ;;  %v468_v40 = vadd.f32 %v1377_v56, %v467_v38  ;;  %v596_v41 = vadd.f32 %v1377_v56, %v595_v39 }
 0x180   : > { %650 = vst [vmem:[%s1385_s8 + $0xd8] sm:$0xff] %v476_v36  ;;  %682 = vst [vmem:[%s1385_s8 + $0x1d8] sm:$0xff] %v604_v37 }
 0x181   : > { %648 = vst [vmem:[%s1385_s8 + $0xc8] sm:$0xff] %v468_v40  ;;  %680 = vst [vmem:[%s1385_s8 + $0x1c8] sm:$0xff] %v596_v41 }
 0x183   : > { %v889_v42 = vpop.f32.mrb[28].mxu0  ;;  %v921_v43 = vpop.f32.mrb[28].mxu1 }
 0x184   : > { %v489_v44 = vadd.f32 %v889_v42, %v1377_v56  ;;  %v617_v45 = vadd.f32 %v921_v43, %v1377_v56  ;;  %v480_v46 = vpop.f32.mrb[29].mxu0  ;;  %v608_v47 = vpop.f32.mrb[29].mxu1 }
 0x185   : > { %v481_v48 = vadd.f32 %v1377_v56, %v480_v46  ;;  %v609_v49 = vadd.f32 %v1377_v56, %v608_v47  ;;  %v890_v50 = vpop.f32.mrb[30].mxu0  ;;  %v922_v51 = vpop.f32.mrb[30].mxu1 }
 0x186   : > { %653 = vst [vmem:[%s1385_s8 + $0xf0] sm:$0xff] %v489_v44  ;;  %685 = vst [vmem:[%s1385_s8 + $0x1f0] sm:$0xff] %v617_v45  ;;  %v492_v52 = vadd.f32 %v890_v50, %v1377_v56  ;;  %v620_v53 = vadd.f32 %v922_v51, %v1377_v56  ;;  %v483_v54 = vpop.f32.mrb[31].mxu0  ;;  %v611_v55 = vpop.f32.mrb[31].mxu1 }
 0x187   : > { %651 = vst [vmem:[%s1385_s8 + $0xe0] sm:$0xff] %v481_v48  ;;  %683 = vst [vmem:[%s1385_s8 + $0x1e0] sm:$0xff] %v609_v49  ;;  %v484_v57 = vadd.f32 %v1377_v56, %v483_v54  ;;  %v612_v58 = vadd.f32 %v1377_v56, %v611_v55 }
 0x188   : > { %654 = vst [vmem:[%s1385_s8 + $0xf8] sm:$0xff] %v492_v52  ;;  %686 = vst [vmem:[%s1385_s8 + $0x1f8] sm:$0xff] %v620_v53 }
 0x189   : > { %652 = vst [vmem:[%s1385_s8 + $0xe8] sm:$0xff] %v484_v57  ;;  %684 = vst [vmem:[%s1385_s8 + $0x1e8] sm:$0xff] %v612_v58 }
 0x18a   : > { %1071 = shalt.err (!%p1068_p7)
}
 0x18b   : > { %s1072_s30 = scalar_lea.hbm %s1508_s5, 8192  ;;  %s1076_s10 = scalar_lea.hbm %s1564_s3, 24576 }
 0x18c   : > { %p1073_p9 = scmp.ne.s32.totalorder %s1508_s5, %s1072_s30  ;;  %p1077_p5 = scmp.lt.u32.totalorder %s1508_s5, %s1564_s3 }
 0x18d   : > { %p1078_p10 = scmp.lt.u32.totalorder %s1076_s10, %s1072_s30  ;;  %p1080_p4 = scmp.lt.u32.totalorder %s1072_s30, %s1508_s5 }
 0x18e   : > { %p1074_p1 = pnand %p1073_p9, %p1243_p12 }
 0x18f   : > { %p1079_p2 = por %p1078_p10, %p1077_p5 }
 0x190   : > { %p1075_p0 = pneg %p1074_p1 }
 0x191   : > { %p1081_p6 = por %p1080_p4, %p1079_p2 }
 0x193   : > { %p1082_p8 = pnand %p1081_p6, %p1075_p0 }
 0x195   : > { %1085 = shalt.err (!%p1082_p8)
}
 0x196   : > { %s1135_s20 = smov 128   ;;  %s1136_s8 = smov 8  }
 0x197   : > { %945 = dma.vmem_to_hbm [thread:$0]  (%p1243_p12), %s1510_s4, 8192, %s1508_s5, %s688_s11, %s1135_s20, %s1135_s20, %s1136_s8  }
 0x198 PF: > { %p962_p11 = scmp.ge.s32.totalorder %s1128_s15, 2  ;;  %s716_s9 = sand.u32 1, %s1116_s12  }
 0x199   : > { %p1579_p13 = scmp.ne.s32.totalorder %s1569_s19, 0  ;;  %s717_s16 = scalar_lea.sflag [#allocation4], %s716_s9 }
 0x19b   : > { %p956_p3 = pnand %p962_p11, %p1579_p13 }
 0x19d   : > { %1111 = dma.done.wait (!%p956_p3), %s717_s16, 8192  }
 0x19e   : > { %1113 = vsyncadd (!%p956_p3), %s717_s16, 4294959104  ;;  %p17_p7 = scmp.ge.s32.totalorder %s1210_s24, 5   ;;  %s1580_s12 = smov %s1120_s13 }
 0x19f   : > { %s1581_s13 = smov %s1124_s14  ;;  %s1582_s14 = smov %s1239_s17 }
 0x1a0   : > { %s1583_s15 = smov %s1210_s24  ;;  %19 = sbr.rel (!%p17_p7) target bundleno = 6 (0x6), region = 81 }
 0x1a7   :  { %722 = vsyncpa [#allocation3], 1 }
 0x1a8   :  { %724 = vsyncpa [#allocation3 + $0x1], 1 }
 0x1a9   :  { %725 = vsyncpa [#allocation6], 1 }
 0x1aa   :  { %726 = vsyncpa [#allocation4], 1 }
 0x1ab   :  { %728 = vsyncpa [#allocation4 + $0x1], 1 }

</bundles_post_ra>
